<compile_context>
chip_gen: v6e
topology: v6e:2x2x1
jax: 0.10.0
libtpu: 0.0.40
codegen_flags: <defaults>
</compile_context>

<pallas_src>
import math

import jax
import jax.numpy as jnp
from jax import lax
from jax.experimental import pallas as pl
from jax.experimental.pallas import tpu as pltpu

_LANE = 128    # TPU lane width (last dim)
_SUBLANE = 8   # TPU sublane width (second-last dim), f32


def _round_up(n, m):
    return ((n + m - 1) // m) * m


def _cdiv(a, b):
    return (a + b - 1) // b


def _vmem_budget_bytes():
    """Plan against ~5/8 of per-core VMEM; conservative fallback = v7x (64 MiB)."""
    cap = 64 * 1024 * 1024
    try:
        info = pltpu.get_tpu_info()
        for attr in ("vmem_capacity_bytes", "vmem_size_bytes", "vmem_bytes"):
            v = getattr(info, attr, None)
            if v:
                cap = int(v)
                break
    except Exception:
        pass
    budget = (cap * 5) // 8
    return max(40 * 1024 * 1024, min(budget, 96 * 1024 * 1024))


def _plan_tiles(B, F, x_itemsize, budget):
    """Pick (tm, tk): batch tile and flattened-feature (reduction) tile."""
    # bf16 packs 16 rows / int8 32 rows per packed vreg -> align tm accordingly.
    sub = {4: _SUBLANE, 2: 16, 1: 32}.get(x_itemsize, _SUBLANE)
    tm = _round_up(min(max(B, 1), 1024), sub)
    if B >= 2 * sub:
        # >= 2 batch-grid steps so the "parallel" axis can feed both v7x cores.
        tm = min(tm, _round_up((B + 1) // 2, sub))

    def fits(tm_, tk_):
        need = (2 * tm_ * tk_ * x_itemsize     # x tile, double-buffered
                + 2 * tk_ * _LANE * 4          # W1 tile, double-buffered
                + tm_ * _LANE * 4              # f32 hidden accumulator scratch
                + 2 * _LANE * _LANE * 4        # W2, double-buffered
                + 2 * tm_ * _LANE * 4          # out tiles + biases headroom
                + (1 << 20))                   # misc slack
        return need <= budget

    tk = F
    tm_floor = min(tm, 256)                    # keep W1 re-reads amortized
    while tm > tm_floor and not fits(tm, tk):
        tm = max(tm_floor, _round_up(tm // 2, sub))
    if not fits(tm, tk):
        # Split the flattened-feature axis (large F): tk multiple of 128.
        tk = _round_up(F, _LANE)
        while tk > _LANE and not fits(tm, tk):
            tk = _round_up(tk // 2, _LANE)
        while tm > sub and not fits(tm, tk):
            tm = _round_up(tm // 2, sub)
    return tm, tk


def phinet_forward(x, params, *, tm=None, tk=None):
    """x: (B, ...) float32 (NCHW like PyTorch). Returns z: (B, n_latent_dims)."""
    w1, b1, w2, b2 = params
    B = x.shape[0]
    F = int(math.prod(x.shape[1:])) if x.ndim > 1 else 1
    x2d = x.reshape(B, F)                      # contiguity-preserving, no HBM copy

    H = w1.shape[1]
    L = w2.shape[1]
    Hp = _round_up(max(H, _LANE), _LANE)
    Lp = _round_up(max(L, _LANE), _LANE)

    itemsize = x2d.dtype.itemsize
    budget = _vmem_budget_bytes()
    auto_tm, auto_tk = _plan_tiles(B, F, itemsize, budget)
    tm = auto_tm if tm is None else _round_up(tm, _SUBLANE)
    tk = auto_tk if tk is None else tk

    nb = _cdiv(B, tm)
    nk = _cdiv(F, tk)
    Fp = nk * tk
    mask_f = (F % tk) != 0                     # ragged flattened-feature edge?

    # Tiny weights: pad hidden/latent dims to full lanes with exact zeros, and
    # zero-pad W1's feature axis to Fp so edge-of-grid W1 blocks are in-bounds
    # zeros (never stale VMEM garbage).
    f32 = jnp.float32
    w1p = jnp.zeros((Fp, Hp), f32).at[:F, :H].set(w1.astype(f32))
    b1p = jnp.zeros((1, Hp), f32).at[:, :H].set(b1.reshape(1, H).astype(f32))
    w2p = jnp.zeros((Hp, Lp), f32).at[:H, :L].set(w2.astype(f32))
    b2p = jnp.zeros((1, Lp), f32).at[:, :L].set(b2.reshape(1, L).astype(f32))

    def kernel(x_ref, w1_ref, b1_ref, w2_ref, b2_ref, out_ref, acc_ref):
        k = pl.program_id(1)

        @pl.when(k == 0)
        def _init():
            acc_ref[...] = jnp.zeros_like(acc_ref)

        xb = x_ref[...]
        if mask_f:
            # Zero any OOB columns of a ragged edge block (stale VMEM could be
            # NaN/Inf; W1's padded zero rows alone would not neutralize that).
            col = lax.broadcasted_iota(jnp.int32, xb.shape, 1)
            xb = jnp.where(col < (F - k * tk), xb, 0)

        acc_ref[...] += jnp.dot(xb, w1_ref[...], preferred_element_type=jnp.float32)

        @pl.when(k == pl.num_programs(1) - 1)
        def _finalize():
            h = jnp.tanh(acc_ref[...] + b1_ref[...])          # EUP tanh, lane-dense
            z = jnp.dot(h, w2_ref[...], preferred_element_type=jnp.float32)
            z = jnp.tanh(z + b2_ref[...])
            out_ref[...] = z[:, :L].astype(out_ref.dtype)     # compact (tm, L) store

    # Advisory cost from true (unpadded) sizes.
    flops = 2 * B * F * H + 2 * B * H * L
    bytes_accessed = (B * F * itemsize + F * H * 4 + H * 4
                      + H * L * 4 + L * 4 + B * L * 4)

    out = pl.pallas_call(
        kernel,
        out_shape=jax.ShapeDtypeStruct((B, L), jnp.float32),
        grid=(nb, nk),
        in_specs=[
            pl.BlockSpec((tm, tk), lambda i, k: (i, k)),      # x row/feature tile
            pl.BlockSpec((tk, Hp), lambda i, k: (k, 0)),      # W1 feature tile
            pl.BlockSpec((1, Hp), lambda i, k: (0, 0)),       # b1 (resident)
            pl.BlockSpec((Hp, Lp), lambda i, k: (0, 0)),      # W2 (resident)
            pl.BlockSpec((1, Lp), lambda i, k: (0, 0)),       # b2 (resident)
        ],
        out_specs=pl.BlockSpec((tm, L), lambda i, k: (i, 0)),
        scratch_shapes=[pltpu.VMEM((tm, Hp), jnp.float32)],   # hidden accumulator
        compiler_params=pltpu.CompilerParams(
            dimension_semantics=("parallel", "arbitrary"),
            vmem_limit_bytes=int(budget),
        ),
        cost_estimate=pl.CostEstimate(
            flops=flops,
            transcendentals=B * (H + L),
            bytes_accessed=bytes_accessed,
        ),
    )(x2d, w1p, b1p, w2p, b2p)
    return out


def init_phinet_params(key, flat_dim, n_units=32, n_latent_dims=4):
    """Deterministic init mimicking torch.nn.Linear default (U(+/- 1/sqrt(fan_in)))."""
    k1, k2, k3, k4 = jax.random.split(key, 4)
    bnd1 = 1.0 / math.sqrt(flat_dim)
    bnd2 = 1.0 / math.sqrt(n_units)
    w1 = jax.random.uniform(k1, (flat_dim, n_units), jnp.float32, -bnd1, bnd1)
    b1 = jax.random.uniform(k2, (1, n_units), jnp.float32, -bnd1, bnd1)
    w2 = jax.random.uniform(k3, (n_units, n_latent_dims), jnp.float32, -bnd2, bnd2)
    b2 = jax.random.uniform(k4, (1, n_latent_dims), jnp.float32, -bnd2, bnd2)
    return (w1, b1, w2, b2)


def phinet_reference(x, params):
    """Pure-JAX reference of the PyTorch forward for verification."""
    w1, b1, w2, b2 = params
    x2d = x.reshape(x.shape[0], -1)
    h = jnp.tanh(x2d @ w1 + b1)
    return jnp.tanh(h @ w2 + b2)


if __name__ == "__main__":
    key = jax.random.PRNGKey(0)
    kx, kp, kx2, kp2 = jax.random.split(key, 4)

    n_latent, n_units = 4, 32

    # --- default-config case: input_shape=(4,16,16), batch=2 ---------------
    B, C, Hs, Ws = 2, 4, 16, 16
    F = C * Hs * Ws
    x = jax.random.normal(kx, (B, C, Hs, Ws), jnp.float32)
    params = init_phinet_params(kp, F, n_units, n_latent)

    z = jax.block_until_ready(phinet_forward(x, params))
    z_ref = phinet_reference(x, params)
    assert z.shape == (B, n_latent)
    assert jnp.allclose(z, z_ref, atol=1e-5, rtol=1e-5), "f32 kernel mismatch"

    # --- ragged case: exercises split-F accumulator, F masking, ragged batch
    B2, C2, Hs2, Ws2 = 30, 3, 13, 13            # F2 = 507 (not /128), B2 not /8
    F2 = C2 * Hs2 * Ws2
    x2 = jax.random.normal(kx2, (B2, C2, Hs2, Ws2), jnp.float32)
    params2 = init_phinet_params(kp2, F2, n_units, n_latent)

    z2 = jax.block_until_ready(phinet_forward(x2, params2, tm=8, tk=128))
    z2_ref = phinet_reference(x2, params2)
    assert z2.shape == (B2, n_latent)
    assert jnp.allclose(z2, z2_ref, atol=1e-4, rtol=1e-4), "split-F kernel mismatch"

    print("KERNEL_OK")
</pallas_src>

<mosaic_0001>
module attributes {stable_mosaic.version = 11 : i64} {
  func.func @kernel(%arg0: i32, %arg1: i32, %arg2: memref<8x1024xf32, #tpu.memory_space<vmem>>, %arg3: memref<1024x128xf32, #tpu.memory_space<vmem>>, %arg4: memref<1x128xf32, #tpu.memory_space<vmem>>, %arg5: memref<128x128xf32, #tpu.memory_space<vmem>>, %arg6: memref<1x128xf32, #tpu.memory_space<vmem>>, %arg7: memref<8x4xf32, #tpu.memory_space<vmem>>, %arg8: memref<8x128xf32, #tpu.memory_space<vmem>>) attributes {dimension_semantics = [#tpu.dimension_semantics<parallel>, #tpu.dimension_semantics<arbitrary>], iteration_bounds = array<i64: 1, 1>, scalar_prefetch = 0 : i64, scratch_operands = 1 : i64, tpu.core_type = #tpu.core_type<tc>, window_params = [{transform_indices = @transform_0, window_bounds = array<i64: 8, 1024>}, {transform_indices = @transform_1, window_bounds = array<i64: 1024, 128>}, {pipeline_mode = #tpu.pipeline_mode<synchronous>, transform_indices = @transform_2, window_bounds = array<i64: 1, 128>}, {pipeline_mode = #tpu.pipeline_mode<synchronous>, transform_indices = @transform_3, window_bounds = array<i64: 128, 128>}, {pipeline_mode = #tpu.pipeline_mode<synchronous>, transform_indices = @transform_4, window_bounds = array<i64: 1, 128>}, {transform_indices = @transform_5, window_bounds = array<i64: 8, 4>}]} {
    %c0_i32 = arith.constant 0 : i32
    %0 = arith.cmpi eq, %arg1, %c0_i32 : i32
    %1 = arith.extui %0 : i1 to i32
    %c0_i32_0 = arith.constant 0 : i32
    %2 = arith.cmpi ne, %1, %c0_i32_0 : i32
    scf.if %2 {
      %cst_10 = arith.constant 0.000000e+00 : f32
      %12 = vector.broadcast %cst_10 : f32 to vector<8x128xf32>
      %c0_11 = arith.constant 0 : index
      %c0_12 = arith.constant 0 : index
      %13 = vector.load %arg8[%c0_11, %c0_12] : memref<8x128xf32, #tpu.memory_space<vmem>>, vector<8x128xf32>
      tpu.vector_store %arg8[%c0_11, %c0_12], %12 {strides = array<i32>} : memref<8x128xf32, #tpu.memory_space<vmem>>, vector<8x128xf32>,
    } else {
    }
    %c0 = arith.constant 0 : index
    %c0_1 = arith.constant 0 : index
    %3 = vector.load %arg2[%c0, %c0_1] : memref<8x1024xf32, #tpu.memory_space<vmem>>, vector<8x1024xf32>
    %c0_2 = arith.constant 0 : index
    %c0_3 = arith.constant 0 : index
    %4 = vector.load %arg8[%c0_2, %c0_3] : memref<8x128xf32, #tpu.memory_space<vmem>>, vector<8x128xf32>
    %c0_4 = arith.constant 0 : index
    %c0_5 = arith.constant 0 : index
    %5 = vector.load %arg3[%c0_4, %c0_5] : memref<1024x128xf32, #tpu.memory_space<vmem>>, vector<1024x128xf32>
    %cst = arith.constant dense<0.000000e+00> : vector<8x128xf32>
    %6 = tpu.matmul %3, %5, %cst {dimension_numbers = #tpu.dot_dimension_numbers<[1], [0], [0], [1], [0, 0, 1, 1], [], []>} : vector<8x1024xf32>, vector<1024x128xf32>, vector<8x128xf32> -> vector<8x128xf32>
    %7 = arith.addf %4, %6 : vector<8x128xf32>
    %c0_6 = arith.constant 0 : index
    %c0_7 = arith.constant 0 : index
    %8 = vector.load %arg8[%c0_6, %c0_7] : memref<8x128xf32, #tpu.memory_space<vmem>>, vector<8x128xf32>
    tpu.vector_store %arg8[%c0_6, %c0_7], %7 {strides = array<i32>} : memref<8x128xf32, #tpu.memory_space<vmem>>, vector<8x128xf32>,
    %c0_i32_8 = arith.constant 0 : i32
    %9 = arith.cmpi eq, %arg1, %c0_i32_8 : i32
    %10 = arith.extui %9 : i1 to i32
    %c0_i32_9 = arith.constant 0 : i32
    %11 = arith.cmpi ne, %10, %c0_i32_9 : i32
    scf.if %11 {
      %c0_10 = arith.constant 0 : index
      %c0_11 = arith.constant 0 : index
      %12 = vector.load %arg8[%c0_10, %c0_11] : memref<8x128xf32, #tpu.memory_space<vmem>>, vector<8x128xf32>
      %c0_12 = arith.constant 0 : index
      %c0_13 = arith.constant 0 : index
      %13 = vector.load %arg4[%c0_12, %c0_13] : memref<1x128xf32, #tpu.memory_space<vmem>>, vector<1x128xf32>
      %14 = vector.broadcast %13 : vector<1x128xf32> to vector<8x128xf32>
      %15 = arith.addf %12, %14 : vector<8x128xf32>
      %16 = math.tanh %15 : vector<8x128xf32>
      %c0_14 = arith.constant 0 : index
      %c0_15 = arith.constant 0 : index
      %17 = vector.load %arg5[%c0_14, %c0_15] : memref<128x128xf32, #tpu.memory_space<vmem>>, vector<128x128xf32>
      %cst_16 = arith.constant dense<0.000000e+00> : vector<8x128xf32>
      %18 = tpu.matmul %16, %17, %cst_16 {dimension_numbers = #tpu.dot_dimension_numbers<[1], [0], [0], [1], [0, 0, 1, 1], [], []>} : vector<8x128xf32>, vector<128x128xf32>, vector<8x128xf32> -> vector<8x128xf32>
      %c0_17 = arith.constant 0 : index
      %c0_18 = arith.constant 0 : index
      %19 = vector.load %arg6[%c0_17, %c0_18] : memref<1x128xf32, #tpu.memory_space<vmem>>, vector<1x128xf32>
      %20 = vector.broadcast %19 : vector<1x128xf32> to vector<8x128xf32>
      %21 = arith.addf %18, %20 : vector<8x128xf32>
      %22 = math.tanh %21 : vector<8x128xf32>
      %23 = vector.extract_strided_slice %22 {offsets = [0, 0], sizes = [8, 4], strides = [1, 1]} : vector<8x128xf32> to vector<8x4xf32>
      %c0_19 = arith.constant 0 : index
      %c0_20 = arith.constant 0 : index
      %24 = vector.load %arg7[%c0_19, %c0_20] : memref<8x4xf32, #tpu.memory_space<vmem>>, vector<8x4xf32>
      tpu.vector_store %arg7[%c0_19, %c0_20], %23 {strides = array<i32>} : memref<8x4xf32, #tpu.memory_space<vmem>>, vector<8x4xf32>,
    } else {
    }
    return
  }
  func.func @transform_0(%arg0: i32, %arg1: i32) -> (i32, i32) {
    %c0_i32 = arith.constant 0 : i32
    return %arg0, %arg1 : i32, i32
  }
  func.func @transform_1(%arg0: i32, %arg1: i32) -> (i32, i32) {
    %c0_i32 = arith.constant 0 : i32
    %c0_i32_0 = arith.constant 0 : i32
    return %arg1, %c0_i32 : i32, i32
  }
  func.func @transform_2(%arg0: i32, %arg1: i32) -> (i32, i32) {
    %c0_i32 = arith.constant 0 : i32
    %c0_i32_0 = arith.constant 0 : i32
    %c0_i32_1 = arith.constant 0 : i32
    return %c0_i32, %c0_i32_0 : i32, i32
  }
  func.func @transform_3(%arg0: i32, %arg1: i32) -> (i32, i32) {
    %c0_i32 = arith.constant 0 : i32
    %c0_i32_0 = arith.constant 0 : i32
    %c0_i32_1 = arith.constant 0 : i32
    return %c0_i32, %c0_i32_0 : i32, i32
  }
  func.func @transform_4(%arg0: i32, %arg1: i32) -> (i32, i32) {
    %c0_i32 = arith.constant 0 : i32
    %c0_i32_0 = arith.constant 0 : i32
    %c0_i32_1 = arith.constant 0 : i32
    return %c0_i32, %c0_i32_0 : i32, i32
  }
  func.func @transform_5(%arg0: i32, %arg1: i32) -> (i32, i32) {
    %c0_i32 = arith.constant 0 : i32
    %c0_i32_0 = arith.constant 0 : i32
    return %arg0, %c0_i32 : i32, i32
  }
}

</mosaic_0001>

<bundles_post_ra>
// kernel: tpu_custom_call.1
= control target key start
LH: loop header
LB: loop body
LE: loop exit
PB: predicated region body
PF: predicated region fallthrough
CT: control target
= control target key end

     0   :  { %10 = vsyncpa [#allocation4], 0  ;;  %s1087_s0 = inlined_call_operand.hbm [shape: f32[2,1024], index: 0, kind: input, shape index: {}]   ;;  %s1088_s1 = inlined_call_operand.hbm [shape: f32[1024,128], index: 1, kind: input, shape index: {}]   ;;  %s1089_s2 = inlined_call_operand.vmem [shape: f32[1,128], index: 2, kind: input, shape index: {}]   ;;  %s1090_s3 = inlined_call_operand.hbm [shape: f32[128,128], index: 3, kind: input, shape index: {}]   ;;  %s1091_s4 = inlined_call_operand.vmem [shape: f32[1,128], index: 4, kind: input, shape index: {}]   ;;  %s1092_s5 = inlined_call_operand.hbm [shape: f32[2,4], index: 5, kind: output, shape index: {}]  }
   0x1   :  { %11 = vsyncpa [#allocation7], 0 }
   0x2   :  { %12 = vsyncpa [#allocation5], 0 }
   0x3   :  { %17 = vsyncadd [#allocation4], 768  ;;  %s1010_s18 = smov [#allocation6]  }
   0x4   :  { %s30_s19 = sshll.u32 %s1010_s18, 4  ;;  %s31_s19 = int_to_ptr.vmem [resolvable:$true] %s30_s19 }
   0x5   :  { %s932_s20 = scalar_lea.vmem %s31_s19, 16384  ;;  %p937_p1 = scmp.lt.s32.totalorder %s31_s19, %s31_s19 }
   0x6   :  { %p933_p0 = scmp.ne.s32.totalorder %s31_s19, %s932_s20  ;;  %p938_p2 = scmp.lt.s32.totalorder %s932_s20, %s932_s20 }
   0x8   :  { %p939_p3 = por %p938_p2, %p937_p1 }
   0xa   :  { %p940_p4 = pnand %p939_p3, %p933_p0 }
   0xc   :  { %943 = shalt.err (!%p940_p4)
}
   0xd   :  { %s1011_s21 = smov 128   ;;  %s1012_s22 = smov 8  }
   0xe   :  { %36 = dma.hbm_to_vmem [thread:$0]  %s1088_s1, 16384, %s31_s19, [#allocation7], %s1011_s21, %s1011_s21, %s1012_s22  }
   0xf   :  { %s1013_s25 = smov [#allocation3]  }
  0x10   :  { %s18_s26 = sshll.u32 %s1013_s25, 4  ;;  %s19_s26 = int_to_ptr.vmem [resolvable:$true] %s18_s26 }
  0x11   :  { %s952_s27 = scalar_lea.vmem %s19_s26, 256  ;;  %s956_s28 = scalar_lea.vmem %s19_s26, 1024 }
  0x12   :  { %p953_p5 = scmp.ne.s32.totalorder %s19_s26, %s952_s27  ;;  %p957_p6 = scmp.lt.s32.totalorder %s19_s26, %s19_s26 }
  0x13   :  { %p958_p7 = scmp.lt.s32.totalorder %s956_s28, %s952_s27 }
  0x15   :  { %p959_p8 = por %p958_p7, %p957_p6 }
  0x17   :  { %p960_p9 = pnand %p959_p8, %p953_p5 }
  0x19   :  { %963 = shalt.err (!%p960_p9)
}
  0x1a   :  { %s1014_s29 = smov 256   ;;  %s1015_s30 = smov 16  }
  0x1b   :  { %24 = dma.hbm_to_vmem [thread:$0]  %s1087_s0, 256, %s19_s26, [#allocation4], %s1014_s29, %s1014_s29, %s1015_s30  }
  0x1c   :  { %s1016_s8 = smov [#allocation8]  }
  0x1d   :  { %s44_s9 = sshll.u32 %s1016_s8, 4  ;;  %s45_s9 = int_to_ptr.vmem [resolvable:$true] %s44_s9 }
  0x1e   :  { %s972_s1 = scalar_lea.vmem %s45_s9, 2048  ;;  %p977_p11 = scmp.lt.s32.totalorder %s45_s9, %s45_s9 }
  0x1f   :  { %p973_p10 = scmp.ne.s32.totalorder %s45_s9, %s972_s1  ;;  %p978_p12 = scmp.lt.s32.totalorder %s972_s1, %s972_s1 }
  0x21   :  { %p979_p13 = por %p978_p12, %p977_p11 }
  0x23   :  { %p980_p0 = pnand %p979_p13, %p973_p10 }
  0x25   :  { %983 = shalt.err (!%p980_p0)
}
  0x26   :  { %50 = dma.hbm_to_vmem [thread:$0]  %s1090_s3, 2048, %s45_s9, [#allocation7], %s1011_s21, %s1011_s21, %s1012_s22  }
  0x27   :  { %1004 = dma.done.wait [#allocation4], 1024  }
  0x28   :  { %1005 = vsyncadd [#allocation4], 4294966272 }
  0x29   :  { %1006 = dma.done.wait [#allocation7], 18432  }
  0x2a   :  { %1007 = vsyncadd [#allocation7], 4294948864  ;;  %v107_v0 = vld [vmem:[#allocation6 + $0xf8] sm:$0xff]  ;;  %v106_v4 = vld [vmem:[#allocation6 + $0xf0] sm:$0xff]  ;;  %v1017_v30 = vmov 1983009808   ;;  %v219_v32 = vlaneseq }
  0x2b   :  { %v139_v1 = vld [vmem:[#allocation6 + $0x1f8] sm:$0xff]  ;;  %703 = vmatprep.subr.mxu0 %v107_v0  ;;  %v138_v5 = vld [vmem:[#allocation6 + $0x1f0] sm:$0xff]  ;;  %v105_v8 = vld [vmem:[#allocation6 + $0xe8] sm:$0xff]  ;;  %v217_v31 = vunpack.c.l.s4 %v1017_v30  ;;  %vm1019_vm0 = vmmov 0   ;;  %vm681_vm1 = vcmask 31744  }
  0x2c   :  { %v91_v2 = vld [vmem:[#allocation6 + $0x78] sm:$0xff]  ;;  %738 = vmatprep.subr.mxu1 %v139_v1  ;;  %v90_v6 = vld [vmem:[#allocation6 + $0x70] sm:$0xff]  ;;  %v137_v9 = vld [vmem:[#allocation6 + $0x1e8] sm:$0xff]  ;;  %v220_v42 = vshrl.u32 %v219_v32, 7 }
  0x2d   :  { %v123_v3 = vld [vmem:[#allocation6 + $0x178] sm:$0xff]  ;;  %704 = vmatpush3.msra.mxu0 %v91_v2  ;;  %v122_v7 = vld [vmem:[#allocation6 + $0x170] sm:$0xff]  ;;  %v89_v10 = vld [vmem:[#allocation6 + $0x68] sm:$0xff]  ;;  %v218_v41 = vunpack.c.0.s8 %v217_v31 }
  0x2e   :  { %739 = vmatpush3.msra.mxu1 %v123_v3  ;;  %705 = vmatprep.subr.mxu0 %v106_v4  ;;  %v121_v11 = vld [vmem:[#allocation6 + $0x168] sm:$0xff]  ;;  %v104_v12 = vld [vmem:[#allocation6 + $0xe0] sm:$0xff]  ;;  %v103_v16 = vld [vmem:[#allocation6 + $0xd8] sm:$0xff] }
  0x2f   :  { %740 = vmatprep.subr.mxu1 %v138_v5  ;;  %706 = vmatpush3.msra.mxu0 %v90_v6  ;;  %v136_v13 = vld [vmem:[#allocation6 + $0x1e0] sm:$0xff]  ;;  %v135_v17 = vld [vmem:[#allocation6 + $0x1d8] sm:$0xff]  ;;  %v102_v20 = vld [vmem:[#allocation6 + $0xd0] sm:$0xff]  ;;  %v1068_v55 = vsub.s32 %v218_v41, %v220_v42 }
  0x30   :  { %741 = vmatpush3.msra.mxu1 %v122_v7  ;;  %707 = vmatprep.subr.mxu0 %v105_v8  ;;  %v88_v14 = vld [vmem:[#allocation6 + $0x60] sm:$0xff]  ;;  %v87_v18 = vld [vmem:[#allocation6 + $0x58] sm:$0xff]  ;;  %v134_v21 = vld [vmem:[#allocation6 + $0x1d0] sm:$0xff] }
  0x31   :  { %742 = vmatprep.subr.mxu1 %v137_v9  ;;  %v120_v15 = vld [vmem:[#allocation6 + $0x160] sm:$0xff]  ;;  %708 = vmatpush3.msra.mxu0 %v89_v10  ;;  %v119_v19 = vld [vmem:[#allocation6 + $0x158] sm:$0xff]  ;;  %v86_v22 = vld [vmem:[#allocation6 + $0x50] sm:$0xff] }
  0x32   :  { %743 = vmatpush3.msra.mxu1 %v121_v11  ;;  %709 = vmatprep.subr.mxu0 %v104_v12  ;;  %v118_v23 = vld [vmem:[#allocation6 + $0x150] sm:$0xff]  ;;  %v101_v24 = vld [vmem:[#allocation6 + $0xc8] sm:$0xff]  ;;  %v100_v28 = vld [vmem:[#allocation6 + $0xc0] sm:$0xff] }
  0x33   :  { %744 = vmatprep.subr.mxu1 %v136_v13  ;;  %710 = vmatpush3.msra.mxu0 %v88_v14  ;;  %v133_v25 = vld [vmem:[#allocation6 + $0x1c8] sm:$0xff]  ;;  %v132_v29 = vld [vmem:[#allocation6 + $0x1c0] sm:$0xff]  ;;  %v99_v35 = vld [vmem:[#allocation6 + $0xb8] sm:$0xff] }
  0x34   :  { %745 = vmatpush3.msra.mxu1 %v120_v15  ;;  %711 = vmatprep.subr.mxu0 %v103_v16  ;;  %v85_v26 = vld [vmem:[#allocation6 + $0x48] sm:$0xff]  ;;  %v84_v33 = vld [vmem:[#allocation6 + $0x40] sm:$0xff]  ;;  %v131_v36 = vld [vmem:[#allocation6 + $0x1b8] sm:$0xff] }
  0x35   :  { %746 = vmatprep.subr.mxu1 %v135_v17  ;;  %712 = vmatpush3.msra.mxu0 %v87_v18  ;;  %v117_v27 = vld [vmem:[#allocation6 + $0x148] sm:$0xff]  ;;  %v116_v34 = vld [vmem:[#allocation6 + $0x140] sm:$0xff]  ;;  %v83_v37 = vld [vmem:[#allocation6 + $0x38] sm:$0xff] }
  0x36   :  { %747 = vmatpush3.msra.mxu1 %v119_v19  ;;  %713 = vmatprep.subr.mxu0 %v102_v20  ;;  %v115_v38 = vld [vmem:[#allocation6 + $0x138] sm:$0xff]  ;;  %v98_v39 = vld [vmem:[#allocation6 + $0xb0] sm:$0xff]  ;;  %v97_v45 = vld [vmem:[#allocation6 + $0xa8] sm:$0xff] }
  0x37   :  { %748 = vmatprep.subr.mxu1 %v134_v21  ;;  %714 = vmatpush3.msra.mxu0 %v86_v22  ;;  %v130_v40 = vld [vmem:[#allocation6 + $0x1b0] sm:$0xff]  ;;  %v129_v46 = vld [vmem:[#allocation6 + $0x1a8] sm:$0xff]  ;;  %v96_v49 = vld [vmem:[#allocation6 + $0xa0] sm:$0xff] }
  0x38   :  { %749 = vmatpush3.msra.mxu1 %v118_v23  ;;  %715 = vmatprep.subr.mxu0 %v101_v24  ;;  %v82_v43 = vld [vmem:[#allocation6 + $0x30] sm:$0xff]  ;;  %v81_v47 = vld [vmem:[#allocation6 + $0x28] sm:$0xff]  ;;  %v128_v50 = vld [vmem:[#allocation6 + $0x1a0] sm:$0xff] }
  0x39   :  { %750 = vmatprep.subr.mxu1 %v133_v25  ;;  %716 = vmatpush3.msra.mxu0 %v85_v26  ;;  %v114_v44 = vld [vmem:[#allocation6 + $0x130] sm:$0xff]  ;;  %v113_v48 = vld [vmem:[#allocation6 + $0x128] sm:$0xff]  ;;  %v80_v51 = vld [vmem:[#allocation6 + $0x20] sm:$0xff] }
  0x3a   :  { %751 = vmatpush3.msra.mxu1 %v117_v27  ;;  %717 = vmatprep.subr.mxu0 %v100_v28  ;;  %v112_v52 = vld [vmem:[#allocation6 + $0x120] sm:$0xff]  ;;  %v95_v53 = vld [vmem:[#allocation6 + $0x98] sm:$0xff]  ;;  %v94_v62 = vld [vmem:[#allocation6 + $0x90] sm:$0xff] }
  0x3b   :  { %752 = vmatprep.subr.mxu1 %v132_v29  ;;  %718 = vmatpush3.msra.mxu0 %v84_v33  ;;  %v127_v54 = vld [vmem:[#allocation6 + $0x198] sm:$0xff]  ;;  %v908_v57 = vld [vmem:[#allocation3] ss:$16 sps:$4 sm:$0xff]   ;;  %v912_v60 = vld [vmem:[#allocation3 + $0x4] ss:$16 sps:$4 sm:$0xff]  }
  0x3c   :  { %753 = vmatpush3.msra.mxu1 %v116_v34  ;;  %719 = vmatprep.subr.mxu0 %v99_v35  ;;  %v79_v56 = vld [vmem:[#allocation6 + $0x18] sm:$0xff]  ;;  %v910_v58 = vld [vmem:[#allocation3 + $0x20] ss:$16 sps:$4 sm:$0xff]   ;;  %v913_v61 = vld [vmem:[#allocation3 + $0x24] ss:$16 sps:$4 sm:$0xff]   ;;  %v222_v0 = vrot.slane %v908_v57, %v1068_v55  ;;  %v229_v4 = vrot.slane %v912_v60, %v1068_v55 }
  0x3d   :  { %754 = vmatprep.subr.mxu1 %v131_v36  ;;  %720 = vmatpush3.msra.mxu0 %v83_v37  ;;  %v111_v59 = vld [vmem:[#allocation6 + $0x118] sm:$0xff]  ;;  %v126_v63 = vld [vmem:[#allocation6 + $0x190] sm:$0xff]  ;;  %v236_v1 = vrot.slane %v910_v58, %v1068_v55  ;;  %v243_v5 = vrot.slane %v913_v61, %v1068_v55  ;;  %v93_v6 = vld [vmem:[#allocation6 + $0x88] sm:$0xff] }
  0x3e   :  { %755 = vmatpush3.msra.mxu1 %v115_v38  ;;  %721 = vmatprep.subr.mxu0 %v98_v39  ;;  %v78_v2 = vld [vmem:[#allocation6 + $0x10] sm:$0xff]  ;;  %v125_v7 = vld [vmem:[#allocation6 + $0x188] sm:$0xff]  ;;  %v92_v10 = vld [vmem:[#allocation6 + $0x80] sm:$0xff] }
  0x3f   :  { %756 = vmatprep.subr.mxu1 %v130_v40  ;;  %722 = vmatpush3.msra.mxu0 %v82_v43  ;;  %v110_v3 = vld [vmem:[#allocation6 + $0x110] sm:$0xff]  ;;  %v77_v8 = vld [vmem:[#allocation6 + $0x8] sm:$0xff]  ;;  %v124_v11 = vld [vmem:[#allocation6 + $0x180] sm:$0xff]  ;;  %v245_v12 = vcombine.high %v222_v0, %v236_v1  ;;  %v247_v14 = vcombine.high %v229_v4, %v243_v5  ;;  %v244_v16 = vcombine.low %v222_v0, %v236_v1 }
  0x40   :  { %757 = vmatpush3.msra.mxu1 %v114_v44  ;;  %723 = vmatprep.subr.mxu0 %v97_v45  ;;  %v109_v9 = vld [vmem:[#allocation6 + $0x108] sm:$0xff]  ;;  %v76_v13 = vld [vmem:[#allocation6] sm:$0xff]  ;;  %v246_v17 = vcombine.low %v229_v4, %v243_v5  ;;  %v171_v18 = vld [vmem:[#allocation6 + $0x2f8] sm:$0xff] }
  0x41   :  { %758 = vmatprep.subr.mxu1 %v129_v46  ;;  %724 = vmatpush3.msra.mxu0 %v81_v47  ;;  %v108_v15 = vld [vmem:[#allocation6 + $0x100] sm:$0xff]  ;;  %v203_v19 = vld [vmem:[#allocation6 + $0x3f8] sm:$0xff]  ;;  %v170_v22 = vld [vmem:[#allocation6 + $0x2f0] sm:$0xff] }
  0x42   :  { %759 = vmatpush3.msra.mxu1 %v113_v48  ;;  %725 = vmatprep.subr.mxu0 %v96_v49  ;;  %v155_v20 = vld [vmem:[#allocation6 + $0x278] sm:$0xff]  ;;  %v202_v23 = vld [vmem:[#allocation6 + $0x3f0] sm:$0xff]  ;;  %v169_v26 = vld [vmem:[#allocation6 + $0x2e8] sm:$0xff] }
  0x43   :  { %760 = vmatprep.subr.mxu1 %v128_v50  ;;  %726 = vmatpush3.msra.mxu0 %v80_v51  ;;  %v187_v21 = vld [vmem:[#allocation6 + $0x378] sm:$0xff]  ;;  %v154_v24 = vld [vmem:[#allocation6 + $0x270] sm:$0xff]  ;;  %v201_v27 = vld [vmem:[#allocation6 + $0x3e8] sm:$0xff] }
  0x44   :  { %761 = vmatpush3.msra.mxu1 %v112_v52  ;;  %727 = vmatprep.subr.mxu0 %v95_v53  ;;  %v186_v25 = vld [vmem:[#allocation6 + $0x370] sm:$0xff]  ;;  %v153_v28 = vld [vmem:[#allocation6 + $0x268] sm:$0xff]  ;;  %v168_v30 = vld [vmem:[#allocation6 + $0x2e0] sm:$0xff] }
  0x45   :  { %762 = vmatprep.subr.mxu1 %v127_v54  ;;  %728 = vmatpush3.msra.mxu0 %v79_v56  ;;  %v185_v29 = vld [vmem:[#allocation6 + $0x368] sm:$0xff]  ;;  %v200_v31 = vld [vmem:[#allocation6 + $0x3e0] sm:$0xff]  ;;  %v167_v34 = vld [vmem:[#allocation6 + $0x2d8] sm:$0xff] }
  0x46   :  { %763 = vmatpush3.msra.mxu1 %v111_v59  ;;  %729 = vmatprep.subr.mxu0 %v94_v62  ;;  %v152_v32 = vld [vmem:[#allocation6 + $0x260] sm:$0xff]  ;;  %v199_v35 = vld [vmem:[#allocation6 + $0x3d8] sm:$0xff]  ;;  %v166_v38 = vld [vmem:[#allocation6 + $0x2d0] sm:$0xff] }
  0x47   :  { %764 = vmatprep.subr.mxu1 %v126_v63  ;;  %730 = vmatpush3.msra.mxu0 %v78_v2  ;;  %v184_v33 = vld [vmem:[#allocation6 + $0x360] sm:$0xff]  ;;  %v151_v36 = vld [vmem:[#allocation6 + $0x258] sm:$0xff]  ;;  %v198_v39 = vld [vmem:[#allocation6 + $0x3d0] sm:$0xff] }
  0x48   :  { %765 = vmatpush3.msra.mxu1 %v110_v3  ;;  %731 = vmatprep.subr.mxu0 %v93_v6  ;;  %v183_v37 = vld [vmem:[#allocation6 + $0x358] sm:$0xff]  ;;  %v150_v40 = vld [vmem:[#allocation6 + $0x250] sm:$0xff]  ;;  %v165_v42 = vld [vmem:[#allocation6 + $0x2c8] sm:$0xff] }
  0x49   :  { %766 = vmatprep.subr.mxu1 %v125_v7  ;;  %732 = vmatpush3.msra.mxu0 %v77_v8  ;;  %v182_v41 = vld [vmem:[#allocation6 + $0x350] sm:$0xff]  ;;  %v197_v43 = vld [vmem:[#allocation6 + $0x3c8] sm:$0xff]  ;;  %v164_v46 = vld [vmem:[#allocation6 + $0x2c0] sm:$0xff] }
  0x4a   :  { %767 = vmatpush3.msra.mxu1 %v109_v9  ;;  %733 = vmatprep.subr.mxu0 %v92_v10  ;;  %v149_v44 = vld [vmem:[#allocation6 + $0x248] sm:$0xff]  ;;  %v196_v47 = vld [vmem:[#allocation6 + $0x3c0] sm:$0xff]  ;;  %v163_v50 = vld [vmem:[#allocation6 + $0x2b8] sm:$0xff] }
  0x4b   :  { %768 = vmatprep.subr.mxu1 %v124_v11  ;;  %734 = vmatpush3.msra.mxu0 %v76_v13  ;;  %v181_v45 = vld [vmem:[#allocation6 + $0x348] sm:$0xff]  ;;  %v148_v48 = vld [vmem:[#allocation6 + $0x240] sm:$0xff]  ;;  %v195_v51 = vld [vmem:[#allocation6 + $0x3b8] sm:$0xff] }
  0x4c   :  { %356 = vmatprep.mubr.f32.mxu0 %v245_v12  ;;  %769 = vmatpush3.msra.mxu1 %v108_v15  ;;  %v180_v49 = vld [vmem:[#allocation6 + $0x340] sm:$0xff]  ;;  %v147_v52 = vld [vmem:[#allocation6 + $0x238] sm:$0xff]  ;;  %v162_v54 = vld [vmem:[#allocation6 + $0x2b0] sm:$0xff] }
  0x4d   :  { %426 = vmatprep.mubr.f32.mxu1 %v247_v14  ;;  %357 = vmatmul.mubr.f32.vlgmr.msra.gmra.mxu0 %v244_v16  ;;  %v179_v53 = vld [vmem:[#allocation6 + $0x338] sm:$0xff]  ;;  %v194_v56 = vld [vmem:[#allocation6 + $0x3b0] sm:$0xff]  ;;  %v161_v59 = vld [vmem:[#allocation6 + $0x2a8] sm:$0xff] }
  0x4e   :  { %427 = vmatmul.mubr.f32.vlgmr.msra.gmra.mxu1 %v246_v17  ;;  %773 = vmatprep.subr.mxu0 %v171_v18  ;;  %v146_v57 = vld [vmem:[#allocation6 + $0x230] sm:$0xff]  ;;  %v193_v60 = vld [vmem:[#allocation6 + $0x3a8] sm:$0xff]  ;;  %v160_v63 = vld [vmem:[#allocation6 + $0x2a0] sm:$0xff] }
  0x4f   :  { %808 = vmatprep.subr.mxu1 %v203_v19  ;;  %774 = vmatpush3.msra.mxu0 %v155_v20  ;;  %v178_v58 = vld [vmem:[#allocation6 + $0x330] sm:$0xff]  ;;  %v145_v61 = vld [vmem:[#allocation6 + $0x228] sm:$0xff]  ;;  %v192_v0 = vld [vmem:[#allocation6 + $0x3a0] sm:$0xff] }
  0x50   :  { %809 = vmatpush3.msra.mxu1 %v187_v21  ;;  %775 = vmatprep.subr.mxu0 %v170_v22  ;;  %v177_v62 = vld [vmem:[#allocation6 + $0x328] sm:$0xff]  ;;  %v144_v1 = vld [vmem:[#allocation6 + $0x220] sm:$0xff]  ;;  %v159_v7 = vld [vmem:[#allocation6 + $0x298] sm:$0xff] }
  0x51   :  { %810 = vmatprep.subr.mxu1 %v202_v23  ;;  %776 = vmatpush3.msra.mxu0 %v154_v24  ;;  %v914_v2 = vld [vmem:[#allocation3 + $0x8] ss:$16 sps:$4 sm:$0xff]   ;;  %v176_v4 = vld [vmem:[#allocation6 + $0x320] sm:$0xff]  ;;  %v918_v5 = vld [vmem:[#allocation3 + $0xc] ss:$16 sps:$4 sm:$0xff]  }
  0x52   :  { %811 = vmatpush3.msra.mxu1 %v186_v25  ;;  %777 = vmatprep.subr.mxu0 %v169_v26  ;;  %v916_v3 = vld [vmem:[#allocation3 + $0x28] ss:$16 sps:$4 sm:$0xff]   ;;  %v919_v6 = vld [vmem:[#allocation3 + $0x2c] ss:$16 sps:$4 sm:$0xff]   ;;  %v158_v11 = vld [vmem:[#allocation6 + $0x290] sm:$0xff]  ;;  %v258_v13 = vrot.slane %v914_v2, %v1068_v55  ;;  %v265_v17 = vrot.slane %v918_v5, %v1068_v55 }
  0x53   :  { %812 = vmatprep.subr.mxu1 %v201_v27  ;;  %778 = vmatpush3.msra.mxu0 %v153_v28  ;;  %v191_v8 = vld [vmem:[#allocation6 + $0x398] sm:$0xff]  ;;  %v190_v12 = vld [vmem:[#allocation6 + $0x390] sm:$0xff]  ;;  %v272_v14 = vrot.slane %v916_v3, %v1068_v55  ;;  %v279_v18 = vrot.slane %v919_v6, %v1068_v55  ;;  %v157_v19 = vld [vmem:[#allocation6 + $0x288] sm:$0xff] }
  0x54   :  { %813 = vmatpush3.msra.mxu1 %v185_v29  ;;  %779 = vmatprep.subr.mxu0 %v168_v30  ;;  %v143_v9 = vld [vmem:[#allocation6 + $0x218] sm:$0xff]  ;;  %v142_v15 = vld [vmem:[#allocation6 + $0x210] sm:$0xff]  ;;  %v189_v20 = vld [vmem:[#allocation6 + $0x388] sm:$0xff] }
  0x55   :  { %814 = vmatprep.subr.mxu1 %v200_v31  ;;  %780 = vmatpush3.msra.mxu0 %v152_v32  ;;  %v175_v10 = vld [vmem:[#allocation6 + $0x318] sm:$0xff]  ;;  %v174_v16 = vld [vmem:[#allocation6 + $0x310] sm:$0xff]  ;;  %v141_v21 = vld [vmem:[#allocation6 + $0x208] sm:$0xff]  ;;  %v281_v25 = vcombine.high %v258_v13, %v272_v14  ;;  %v283_v27 = vcombine.high %v265_v17, %v279_v18  ;;  %v280_v28 = vcombine.low %v258_v13, %v272_v14  ;;  %v1018_v31 = vmov 0.0  }
  0x56   :  { %815 = vmatpush3.msra.mxu1 %v184_v33  ;;  %781 = vmatprep.subr.mxu0 %v167_v34  ;;  %v173_v22 = vld [vmem:[#allocation6 + $0x308] sm:$0xff]  ;;  %v156_v23 = vld [vmem:[#allocation6 + $0x280] sm:$0xff]  ;;  %v282_v29 = vcombine.low %v265_v17, %v279_v18  ;;  %v602_v30 = vld [vmem:[#allocation8 + $0x78] sm:$0xff] }
  0x57   :  { %816 = vmatprep.subr.mxu1 %v199_v35  ;;  %782 = vmatpush3.msra.mxu0 %v151_v36  ;;  %v188_v24 = vld [vmem:[#allocation6 + $0x380] sm:$0xff]  ;;  %v601_v32 = vld [vmem:[#allocation8 + $0x70] sm:$0xff]  ;;  %v600_v33 = vld [vmem:[#allocation8 + $0x68] sm:$0xff] }
  0x58   :  { %817 = vmatpush3.msra.mxu1 %v183_v37  ;;  %783 = vmatprep.subr.mxu0 %v166_v38  ;;  %v140_v26 = vld [vmem:[#allocation6 + $0x200] sm:$0xff]  ;;  %v598_v35 = vld [vmem:[#allocation8 + $0x58] sm:$0xff]  ;;  %v597_v36 = vld [vmem:[#allocation8 + $0x50] sm:$0xff] }
  0x59   :  { %818 = vmatprep.subr.mxu1 %v198_v39  ;;  %784 = vmatpush3.msra.mxu0 %v150_v40  ;;  %v172_v55 = vld [vmem:[#allocation6 + $0x300] sm:$0xff]  ;;  %v596_v37 = vld [vmem:[#allocation8 + $0x48] sm:$0xff]  ;;  %v594_v39 = vld [vmem:[#allocation8 + $0x38] sm:$0xff] }
  0x5a   :  { %819 = vmatpush3.msra.mxu1 %v182_v41  ;;  %785 = vmatprep.subr.mxu0 %v165_v42  ;;  %v599_v34 = vld [vmem:[#allocation8 + $0x60] sm:$0xff]  ;;  %v593_v40 = vld [vmem:[#allocation8 + $0x30] sm:$0xff]  ;;  %v592_v41 = vld [vmem:[#allocation8 + $0x28] sm:$0xff] }
  0x5b   :  { %820 = vmatprep.subr.mxu1 %v197_v43  ;;  %786 = vmatpush3.msra.mxu0 %v149_v44  ;;  %v595_v38 = vld [vmem:[#allocation8 + $0x40] sm:$0xff]  ;;  %v590_v43 = vld [vmem:[#allocation8 + $0x18] sm:$0xff]  ;;  %v589_v44 = vld [vmem:[#allocation8 + $0x10] sm:$0xff] }
  0x5c   :  { %821 = vmatpush3.msra.mxu1 %v181_v45  ;;  %787 = vmatprep.subr.mxu0 %v164_v46  ;;  %v591_v42 = vld [vmem:[#allocation8 + $0x20] sm:$0xff]  ;;  %v588_v45 = vld [vmem:[#allocation8 + $0x8] sm:$0xff] }
  0x5d   :  { %822 = vmatprep.subr.mxu1 %v196_v47  ;;  %788 = vmatpush3.msra.mxu0 %v148_v48  ;;  %v587_v46 = vld [vmem:[#allocation8] sm:$0xff] }
  0x5e   :  { %823 = vmatpush3.msra.mxu1 %v180_v49  ;;  %789 = vmatprep.subr.mxu0 %v163_v50  ;;  %v702_v2 = vld [vmem:[%s1091_s4] ss:$0 sm:$0xff] }
  0x5f   :  { %824 = vmatprep.subr.mxu1 %v195_v51  ;;  %790 = vmatpush3.msra.mxu0 %v147_v52 }
  0x60   :  { %825 = vmatpush3.msra.mxu1 %v179_v53  ;;  %791 = vmatprep.subr.mxu0 %v162_v54 }
  0x61   :  { %826 = vmatprep.subr.mxu1 %v194_v56  ;;  %792 = vmatpush3.msra.mxu0 %v146_v57 }
  0x62   :  { %827 = vmatpush3.msra.mxu1 %v178_v58  ;;  %793 = vmatprep.subr.mxu0 %v161_v59 }
  0x63   :  { %828 = vmatprep.subr.mxu1 %v193_v60  ;;  %794 = vmatpush3.msra.mxu0 %v145_v61 }
  0x64   :  { %829 = vmatpush3.msra.mxu1 %v177_v62  ;;  %795 = vmatprep.subr.mxu0 %v160_v63  ;;  %v701_v62 = vld [vmem:[%s1089_s2] ss:$0 sm:$0xff] }
  0x65   :  { %830 = vmatprep.subr.mxu1 %v192_v0  ;;  %796 = vmatpush3.msra.mxu0 %v144_v1 }
  0x66   :  { %831 = vmatpush3.msra.mxu1 %v176_v4  ;;  %797 = vmatprep.subr.mxu0 %v159_v7 }
  0x67   :  { %832 = vmatprep.subr.mxu1 %v191_v8  ;;  %798 = vmatpush3.msra.mxu0 %v143_v9 }
  0x68   :  { %833 = vmatpush3.msra.mxu1 %v175_v10  ;;  %799 = vmatprep.subr.mxu0 %v158_v11 }
  0x69   :  { %834 = vmatprep.subr.mxu1 %v190_v12  ;;  %800 = vmatpush3.msra.mxu0 %v142_v15 }
  0x6a   :  { %835 = vmatpush3.msra.mxu1 %v174_v16  ;;  %801 = vmatprep.subr.mxu0 %v157_v19 }
  0x6b   :  { %836 = vmatprep.subr.mxu1 %v189_v20  ;;  %802 = vmatpush3.msra.mxu0 %v141_v21 }
  0x6c   :  { %837 = vmatpush3.msra.mxu1 %v173_v22  ;;  %803 = vmatprep.subr.mxu0 %v156_v23 }
  0x6d   :  { %838 = vmatprep.subr.mxu1 %v188_v24  ;;  %804 = vmatpush3.msra.mxu0 %v140_v26 }
  0x6e   :  { %496 = vmatprep.mubr.f32.mxu0 %v281_v25  ;;  %839 = vmatpush3.msra.mxu1 %v172_v55 }
  0x6f   :  { %566 = vmatprep.mubr.f32.mxu1 %v283_v27  ;;  %497 = vmatmul.mubr.f32.vlgmr.msra.gmra.mxu0 %v280_v28 }
  0x70   :  { %567 = vmatmul.mubr.f32.vlgmr.msra.gmra.mxu1 %v282_v29  ;;  %860 = vmatprep.subr.mxu0 %v1018_v31 }
  0x71   :  { %861 = vmatpush3.msra.mxu0 %v602_v30  ;;  %892 = vmatprep.mubr.msk.f32.mxu0 %vm1019_vm0, %v1018_v31 }
  0x72   :  { %862 = vmatprep.subr.mxu0 %v1018_v31 }
  0x73   :  { %863 = vmatpush3.msra.mxu0 %v601_v32 }
  0x74   :  { %864 = vmatprep.subr.mxu0 %v1018_v31 }
  0x75   :  { %865 = vmatpush3.msra.mxu0 %v600_v33 }
  0x76   :  { %866 = vmatprep.subr.mxu0 %v1018_v31 }
  0x77   :  { %867 = vmatpush3.msra.mxu0 %v599_v34 }
  0x78   :  { %868 = vmatprep.subr.mxu0 %v1018_v31 }
  0x79   :  { %869 = vmatpush3.msra.mxu0 %v598_v35 }
  0x7a   :  { %870 = vmatprep.subr.mxu0 %v1018_v31 }
  0x7b   :  { %871 = vmatpush3.msra.mxu0 %v597_v36 }
  0x7c   :  { %872 = vmatprep.subr.mxu0 %v1018_v31 }
  0x7d   :  { %873 = vmatpush3.msra.mxu0 %v596_v37 }
  0x7e   :  { %874 = vmatprep.subr.mxu0 %v1018_v31 }
  0x7f   :  { %875 = vmatpush3.msra.mxu0 %v595_v38 }
  0x80   :  { %876 = vmatprep.subr.mxu0 %v1018_v31 }
  0x81   :  { %877 = vmatpush3.msra.mxu0 %v594_v39 }
  0x82   :  { %878 = vmatprep.subr.mxu0 %v1018_v31 }
  0x83   :  { %879 = vmatpush3.msra.mxu0 %v593_v40 }
  0x84   :  { %880 = vmatprep.subr.mxu0 %v1018_v31 }
  0x85   :  { %881 = vmatpush3.msra.mxu0 %v592_v41 }
  0x86   :  { %882 = vmatprep.subr.mxu0 %v1018_v31 }
  0x87   :  { %883 = vmatpush3.msra.mxu0 %v591_v42 }
  0x88   :  { %884 = vmatprep.subr.mxu0 %v1018_v31 }
  0x89   :  { %885 = vmatpush3.msra.mxu0 %v590_v43 }
  0x8a   :  { %886 = vmatprep.subr.mxu0 %v1018_v31 }
  0x8b   :  { %887 = vmatpush3.msra.mxu0 %v589_v44 }
  0x8c   :  { %888 = vmatprep.subr.mxu0 %v1018_v31 }
  0x8d   :  { %889 = vmatpush3.msra.mxu0 %v588_v45 }
  0x8e   :  { %890 = vmatprep.subr.mxu0 %v1018_v31 }
  0x8f   :  { %891 = vmatpush3.msra.mxu0 %v587_v46 }
 0x10d   :  { %v735_v47 = vpop.f32.mrf.mxu0 }
 0x10e   :  { %v770_v48 = vpop.f32.mrf.mxu1 }
 0x10f   :  { %v736_v49 = vpop.f32.mrf.mxu0 }
 0x110   :  { %v771_v50 = vpop.f32.mrf.mxu1  ;;  %v737_v51 = vadd.f32 %v736_v49, %v735_v47 }
 0x111   :  { %v772_v52 = vadd.f32 %v771_v50, %v770_v48 }
 0x113   :  { %v429_v58 = vadd.f32 %v772_v52, %v737_v51 }
 0x12f   :  { %v805_v53 = vpop.f32.mrf.mxu0 }
 0x130   :  { %v840_v54 = vpop.f32.mrf.mxu1 }
 0x131   :  { %v806_v56 = vpop.f32.mrf.mxu0 }
 0x132   :  { %v841_v57 = vpop.f32.mrf.mxu1  ;;  %v807_v59 = vadd.f32 %v806_v56, %v805_v53 }
 0x133   :  { %v842_v61 = vadd.f32 %v841_v57, %v840_v54 }
 0x134   :  { %v499_v60 = vadd.f32 %v807_v59, %v429_v58 }
 0x136   :  { %v569_v63 = vadd.f32 %v842_v61, %v499_v60 }
 0x138   :  { %v585_v0 = vadd.f32 %v701_v62, %v569_v63 }
 0x13a   :  { %920 = vtanh.f32 %v585_v0 }
 0x147   :  { %v921_v1 = vpop.eup %920 }
 0x148   :  { %893 = vmatmul.mubr.f32.vlgmr.msra.gmra.mxu0 %v921_v1 }
 0x208   :  { %v676_v3 = vpop.f32.mrf.mxu0 }
 0x209   :  { %v677_v4 = vadd.f32 %v702_v2, %v676_v3 }
 0x20a   :  { %v894_v5 = vpop.f32.mrf.mxu0 }
 0x20b   :  { %922 = vtanh.f32 %v677_v4 }
 0x218   :  { %v923_v6 = vpop.eup %922 }
 0x219   :  { %682 = vst.msk [vmem:[#allocation9] sm:$0xff] %vm681_vm1, %v923_v6 }
 0x21a   :  { %687 = vsyncadd [#allocation5], 96  ;;  %s1020_s14 = smov [#allocation9]  }
 0x21b   :  { %s688_s15 = sshll.u32 %s1020_s14, 4  ;;  %s689_s15 = int_to_ptr.vmem [resolvable:$true] %s688_s15 }
 0x21c   :  { %s984_s2 = scalar_lea.vmem %s689_s15, 32  ;;  %s988_s16 = scalar_lea.vmem %s689_s15, 128 }
 0x21d   :  { %p985_p1 = scmp.ne.s32.totalorder %s689_s15, %s984_s2  ;;  %p989_p2 = scmp.lt.s32.totalorder %s689_s15, %s689_s15 }
 0x21e   :  { %p990_p3 = scmp.lt.s32.totalorder %s988_s16, %s984_s2 }
 0x220   :  { %p991_p4 = por %p990_p3, %p989_p2 }
 0x222   :  { %p992_p5 = pnand %p991_p4, %p985_p1 }
 0x224   :  { %995 = shalt.err (!%p992_p5)
}
 0x225   :  { %s1021_s4 = smov 32   ;;  %s1022_s17 = smov 2  }
 0x226   :  { %694 = dma.vmem_to_hbm [thread:$0]  %s689_s15, 32, %s1092_s5, [#allocation5], %s1021_s4, %s1021_s4, %s1022_s17  }
 0x227   :  { %1008 = dma.done.wait [#allocation5], 128  }
 0x228   :  { %1009 = vsyncadd [#allocation5], 4294967168 }
 0x229   :  { %698 = vsyncpa [#allocation4], 1 }
 0x22a   :  { %699 = vsyncpa [#allocation7], 1 }
 0x22b   :  { %700 = vsyncpa [#allocation5], 1 }

</bundles_post_ra>
